<compile_context>
chip_gen: v7x
topology: tpu7x:2x2x1
jax: 0.10.0
libtpu: 0.0.40
codegen_flags: <defaults>
</compile_context>

<pallas_src>
import functools

import jax
import jax.numpy as jnp
from jax import lax
from jax.experimental import pallas as pl
from jax.experimental.pallas import tpu as pltpu


def _round_up(x: int, m: int) -> int:
    return ((x + m - 1) // m) * m


def _vmem_limit_bytes() -> int:
    """Generation-aware scoped-VMEM budget: 75% of physical, capped at 100 MiB.
    (v5e/v6e: 128 MiB physical -> 96 MiB; v7x: 64 MiB physical -> 48 MiB)."""
    try:
        cap = int(pltpu.get_tpu_info().vmem_capacity_bytes)
    except Exception:
        cap = 64 * 1024 * 1024  # conservative default (v7x-sized)
    return min((cap * 3) // 4, 100 * 1024 * 1024)


_VMEM_LIMIT = _vmem_limit_bytes()
_MAX_STREAM_BUDGET = 24 * 1024 * 1024  # cap per double-buffered stream


def _pick_tile(total: int, unit: int, other: int, itemsize: int, budget: int) -> int:
    """Largest multiple of `unit` (need not divide `total`; the axis is padded up to a
    multiple of the result) whose double-buffered (other x tile) block fits `budget`."""
    max_tile = budget // (2 * other * itemsize)
    max_tile = max(unit, (max_tile // unit) * unit)
    return int(min(max_tile, _round_up(total, unit)))


# --------------------------------------------------------------------------------------
# Shared Newton–Schulz whitener (traced inside kernels).  g = centered gram = (c-1)*sigma
# --------------------------------------------------------------------------------------
def _newton_schulz_whitener(g, c: int, iterations: int):
    dim = g.shape[0]
    rows = lax.broadcasted_iota(jnp.int32, (dim, dim), 0)
    cols = lax.broadcasted_iota(jnp.int32, (dim, dim), 1)
    eyeb = rows == cols
    eye = jnp.where(eyeb, jnp.float32(1.0), jnp.float32(0.0))

    trace = jnp.sum(jnp.where(eyeb, g, jnp.float32(0.0)))
    trace = jnp.maximum(trace, jnp.float32(1e-12))          # guard degenerate input
    sigma_n = g * (jnp.float32(1.0) / trace)                # trace-normalized sigma

    if iterations >= 1:
        # Iteration 0 specialized: P0 = I  =>  P1 = 1.5 I - 0.5 sigma_n  (no matmuls).
        p = 1.5 * eye - 0.5 * sigma_n
        for _ in range(iterations - 1):                     # unrolled static loop
            p2 = jnp.dot(p, p, preferred_element_type=jnp.float32)
            p3 = jnp.dot(p2, p, preferred_element_type=jnp.float32)
            p = 1.5 * p - 0.5 * jnp.dot(p3, sigma_n, preferred_element_type=jnp.float32)
    else:
        p = eye

    # W = P / sqrt(tr(sigma)) with sigma = G/(c-1)  ->  W = P * rsqrt(tr(G)/(c-1))
    return p * lax.rsqrt(trace * jnp.float32(1.0 / (c - 1)))


# --------------------------------------------------------------------------------------
# Small-problem fused path: X resident in VMEM, centered gram + NS + apply in one launch.
# --------------------------------------------------------------------------------------
def _fused_kernel(x_ref, o_ref, *, axis: int, c: int, iterations: int,
                  n_valid: int, d_valid: int):
    x = x_ref[...].astype(jnp.float32)
    n_pad, d_pad = x.shape
    if axis == 0:
        mean = jnp.sum(x, axis=1, keepdims=True) * jnp.float32(1.0 / c)   # (n_pad, 1)
        xn = x - mean
        if d_pad != d_valid:   # mask padded feature columns so centering stays inert
            col = lax.broadcasted_iota(jnp.int32, (n_pad, d_pad), 1)
            xn = jnp.where(col < d_valid, xn, jnp.float32(0.0))
        g = lax.dot_general(xn, xn, (((1,), (1,)), ((), ())),
                            preferred_element_type=jnp.float32)           # (n_pad,n_pad)
        w = _newton_schulz_whitener(g, c, iterations)
        out = lax.dot_general(w, xn, (((0,), (0,)), ((), ())),            # W^T @ xn
                              preferred_element_type=jnp.float32)
    else:
        mean = jnp.sum(x, axis=0, keepdims=True) * jnp.float32(1.0 / c)   # (1, d_pad)
        xn = x - mean
        if n_pad != n_valid:   # mask padded batch rows
            row = lax.broadcasted_iota(jnp.int32, (n_pad, d_pad), 0)
            xn = jnp.where(row < n_valid, xn, jnp.float32(0.0))
        g = lax.dot_general(xn, xn, (((0,), (0,)), ((), ())),
                            preferred_element_type=jnp.float32)           # (d_pad,d_pad)
        w = _newton_schulz_whitener(g, c, iterations)
        out = jnp.dot(xn, w, preferred_element_type=jnp.float32)          # xn @ W
    o_ref[...] = out.astype(o_ref.dtype)


# --------------------------------------------------------------------------------------
# Streaming phase 1: tiled stats (raw gram + sums) with the NS solve fused on last step.
# --------------------------------------------------------------------------------------
def _stats_ns_kernel(x_ref, w_ref, mean_ref, g_acc, s_acc, *,
                     axis: int, c: int, iterations: int):
    @pl.when(pl.program_id(0) == 0)
    def _():
        g_acc[...] = jnp.zeros_like(g_acc)
        s_acc[...] = jnp.zeros_like(s_acc)

    x = x_ref[...]                         # native dtype feeds the MXU directly
    if axis == 0:
        g_acc[...] += lax.dot_general(x, x, (((1,), (1,)), ((), ())),
                                      preferred_element_type=jnp.float32)
        if x.dtype == jnp.float32:
            s_acc[...] += jnp.sum(x, axis=1, keepdims=True)
        else:                              # avoid a full-tile f32 temp: ride the MXU
            ones = jnp.ones((x.shape[1], 1), dtype=x.dtype)
            s_acc[...] += jnp.dot(x, ones, preferred_element_type=jnp.float32)
    else:
        g_acc[...] += lax.dot_general(x, x, (((0,), (0,)), ((), ())),
                                      preferred_element_type=jnp.float32)
        if x.dtype == jnp.float32:
            s_acc[...] += jnp.sum(x, axis=0, keepdims=True)
        else:
            ones = jnp.ones((1, x.shape[0]), dtype=x.dtype)
            s_acc[...] += jnp.dot(ones, x, preferred_element_type=jnp.float32)

    @pl.when(pl.program_id(0) == pl.num_programs(0) - 1)
    def _():
        s = s_acc[...]
        inv_c = jnp.float32(1.0 / c)
        # Rank-1 mean correction: G = G_raw - s s^T / c
        # TODO(synk): one-pass formula is cancellation-prone for |mean| >> std.
        if axis == 0:
            outer = lax.dot_general(s, s, (((1,), (1,)), ((), ())),
                                    preferred_element_type=jnp.float32)
        else:
            outer = lax.dot_general(s, s, (((0,), (0,)), ((), ())),
                                    preferred_element_type=jnp.float32)
        g = g_acc[...] - outer * inv_c
        w = _newton_schulz_whitener(g, c, iterations)
        w_ref[...] = w.astype(w_ref.dtype)                 # emitted in mm_dtype
        mean_ref[...] = (s * inv_c).astype(mean_ref.dtype)  # mean precomputed once


# --------------------------------------------------------------------------------------
# Streaming phase 2: apply the whitening matrix, tiled over the free axis ("parallel").
# --------------------------------------------------------------------------------------
def _apply_kernel(x_ref, w_ref, mean_ref, o_ref, *, axis: int, mm_dtype):
    # W and mean already arrive in mm_dtype; for f32/bf16 inputs the astype is a no-op.
    xn = x_ref[...].astype(mm_dtype) - mean_ref[...]
    w = w_ref[...]
    if axis == 0:
        out = lax.dot_general(w, xn, (((0,), (0,)), ((), ())),   # W^T @ xn[:, tile]
                              preferred_element_type=jnp.float32)
    else:
        out = jnp.dot(xn, w, preferred_element_type=jnp.float32)  # xn[tile, :] @ W
    o_ref[...] = out.astype(o_ref.dtype)


# --------------------------------------------------------------------------------------
# Wrapper
# --------------------------------------------------------------------------------------
@functools.partial(jax.jit, static_argnames=("axis", "iterations", "force_streaming",
                                             "stream_budget"))
def whitening2d(x, *, axis: int = 0, iterations: int = 4,
                force_streaming: bool = False, stream_budget=None):
    """Pallas-backed forward of Whitening2d. x: (N, D) float array."""
    assert axis in (0, 1), "axis must be in (channel, batch) !"
    # TODO(synk): FullGatherLayer all_gather across devices not implemented (identity here).
    n, d = x.shape
    c = d if axis == 0 else n              # contraction length; reference divides by (c-1)
    assert c > 1, "need at least 2 elements along the contraction axis"

    itemsize = jnp.dtype(x.dtype).itemsize
    mm_dtype = jnp.bfloat16 if x.dtype == jnp.bfloat16 else jnp.float32
    mm_itemsize = jnp.dtype(mm_dtype).itemsize

    n_pad0 = _round_up(n, 8)
    d_pad0 = _round_up(d, 128)
    dim = n_pad0 if axis == 0 else d_pad0
    vmem_limit = _VMEM_LIMIT

    # -------- small-problem fused path: one launch, one HBM read + one write of X -----
    fused_bytes = (n_pad0 * d_pad0 * (2 * itemsize + 8)   # x in/out + f32 centered/out
                   + 8 * dim * dim * 4)                   # gram + NS temporaries
    if (not force_streaming) and fused_bytes <= int(vmem_limit * 0.6):
        x_p = x
        if (n_pad0, d_pad0) != (n, d):
            x_p = jnp.pad(x, ((0, n_pad0 - n), (0, d_pad0 - d)))
        out_p = pl.pallas_call(
            functools.partial(_fused_kernel, axis=axis, c=c, iterations=iterations,
                              n_valid=n, d_valid=d),
            out_shape=jax.ShapeDtypeStruct((n_pad0, d_pad0), x.dtype),
            in_specs=[pl.BlockSpec(memory_space=pltpu.MemorySpace.VMEM)],
            out_specs=pl.BlockSpec(memory_space=pltpu.MemorySpace.VMEM),
            compiler_params=pltpu.CompilerParams(vmem_limit_bytes=vmem_limit),
        )(x_p)
        return out_p[:n, :d] if (n_pad0, d_pad0) != (n, d) else out_p

    # -------- streaming path: (stats + fused NS) pass, then apply pass ----------------
    if axis == 0:
        other, total, unit = n_pad0, d, 128     # blocks are (n_pad0, tile) along D
    else:
        other, total, unit = d_pad0, n, 8       # blocks are (tile, d_pad0) along N

    acc_bytes = dim * dim * 4
    ns_tmp_bytes = 6 * dim * dim * 4
    w_bytes = dim * dim * mm_itemsize
    headroom = 2 * 1024 * 1024
    avail1 = vmem_limit - acc_bytes - ns_tmp_bytes - w_bytes - headroom   # 1 input stream
    avail2 = (vmem_limit - w_bytes - headroom) // 3                       # x, out, temps
    budget = min(avail1, avail2, _MAX_STREAM_BUDGET)
    if stream_budget is not None:
        budget = min(budget, int(stream_budget))
    budget = max(budget, 2 * other * unit * itemsize)    # always allow one unit-wide tile
    tile = _pick_tile(total, unit, other, itemsize, budget)
    total_pad = _round_up(total, tile)
    grid_n = total_pad // tile

    if axis == 0:
        n_pad, d_pad = n_pad0, total_pad
        blk = (n_pad, tile)
        idx = lambda k: (0, k)
        s_shape = (dim, 1)
    else:
        n_pad, d_pad = total_pad, d_pad0
        blk = (tile, d_pad)
        idx = lambda k: (k, 0)
        s_shape = (1, dim)

    x_p = x
    if (n_pad, d_pad) != (n, d):
        x_p = jnp.pad(x, ((0, n_pad - n), (0, d_pad - d)))

    # phase 1: reduction grid, resident f32 accumulators, NS fused into the last step
    w, mean = pl.pallas_call(
        functools.partial(_stats_ns_kernel, axis=axis, c=c, iterations=iterations),
        out_shape=(jax.ShapeDtypeStruct((dim, dim), mm_dtype),
                   jax.ShapeDtypeStruct(s_shape, mm_dtype)),
        grid=(grid_n,),
        in_specs=[pl.BlockSpec(blk, idx)],
        out_specs=(pl.BlockSpec((dim, dim), lambda k: (0, 0)),
                   pl.BlockSpec(s_shape, lambda k: (0, 0))),
        scratch_shapes=[pltpu.VMEM((dim, dim), jnp.float32),
                        pltpu.VMEM(s_shape, jnp.float32)],
        compiler_params=pltpu.CompilerParams(
            dimension_semantics=("arbitrary",),
            vmem_limit_bytes=vmem_limit),
    )(x_p)

    # phase 2: parallel grid over the free axis; no per-step casts inside the kernel
    out_p = pl.pallas_call(
        functools.partial(_apply_kernel, axis=axis, mm_dtype=mm_dtype),
        out_shape=jax.ShapeDtypeStruct((n_pad, d_pad), x.dtype),
        grid=(grid_n,),
        in_specs=[pl.BlockSpec(blk, idx),
                  pl.BlockSpec((dim, dim), lambda k: (0, 0)),
                  pl.BlockSpec(s_shape, lambda k: (0, 0))],
        out_specs=pl.BlockSpec(blk, idx),
        compiler_params=pltpu.CompilerParams(
            dimension_semantics=("parallel",),
            vmem_limit_bytes=vmem_limit),
    )(x_p, w, mean)

    return out_p[:n, :d] if (n_pad, d_pad) != (n, d) else out_p


# --------------------------------------------------------------------------------------
# Pure-JAX reference mirroring the PyTorch semantics (for the sanity check).
# --------------------------------------------------------------------------------------
def _whitening2d_ref(x, *, axis: int = 0, iterations: int = 4):
    x = x.astype(jnp.float32)
    n, d = x.shape
    if axis == 0:
        m = jnp.mean(x, axis=1, keepdims=True)
        xn = x - m
        sigma = (xn @ xn.T) / (d - 1)
        dim = n
    else:
        m = jnp.mean(x, axis=0, keepdims=True)
        xn = x - m
        sigma = (xn.T @ xn) / (n - 1)
        dim = d
    eye = jnp.eye(dim, dtype=jnp.float32)
    trace = jnp.trace(sigma)
    sigma_n = sigma / trace
    p = eye
    for _ in range(iterations):
        p = 1.5 * p - 0.5 * (p @ p @ p @ sigma_n)
    w = p / jnp.sqrt(trace)
    if axis == 0:
        return w.T @ xn
    return xn @ w


if __name__ == "__main__":
    key = jax.random.PRNGKey(0)
    k0, k1, k2 = jax.random.split(key, 3)

    # axis=0 (whiten across the sample dimension): batch=8, hidden=32 — fused path
    x0 = jax.random.normal(k0, (8, 32), dtype=jnp.float32)
    out0 = jax.block_until_ready(whitening2d(x0, axis=0, iterations=4))
    ref0 = _whitening2d_ref(x0, axis=0, iterations=4)
    assert out0.shape == x0.shape
    assert bool(jnp.all(jnp.isfinite(out0)))
    err0 = float(jnp.max(jnp.abs(out0 - ref0)))
    assert err0 < 5e-3, f"axis=0 fused mismatch vs reference: {err0}"

    # axis=1 (whiten across the feature dimension): batch=64, hidden=32 — fused path
    x1 = jax.random.normal(k1, (64, 32), dtype=jnp.float32)
    out1 = jax.block_until_ready(whitening2d(x1, axis=1, iterations=4))
    ref1 = _whitening2d_ref(x1, axis=1, iterations=4)
    assert out1.shape == x1.shape
    assert bool(jnp.all(jnp.isfinite(out1)))
    err1 = float(jnp.max(jnp.abs(out1 - ref1)))
    assert err1 < 5e-3, f"axis=1 fused mismatch vs reference: {err1}"

    # streaming path, forced with a tiny stream budget so the reduction grid has >1 step
    x2 = jax.random.normal(k2, (8, 384), dtype=jnp.float32)
    out2 = jax.block_until_ready(
        whitening2d(x2, axis=0, iterations=4, force_streaming=True,
                    stream_budget=16 * 1024))
    ref2 = _whitening2d_ref(x2, axis=0, iterations=4)
    err2 = float(jnp.max(jnp.abs(out2 - ref2)))
    assert err2 < 5e-3, f"axis=0 streaming mismatch vs reference: {err2}"

    out3 = jax.block_until_ready(
        whitening2d(x1, axis=1, iterations=4, force_streaming=True,
                    stream_budget=16 * 1024))
    err3 = float(jnp.max(jnp.abs(out3 - ref1)))
    assert err3 < 5e-3, f"axis=1 streaming mismatch vs reference: {err3}"

    print("KERNEL_OK")
</pallas_src>

<mosaic_0001>
module attributes {stable_mosaic.version = 11 : i64} {
  func.func @_fused_kernel(%arg0: memref<8x128xf32, #tpu.memory_space<vmem>>, %arg1: memref<8x128xf32, #tpu.memory_space<vmem>>) attributes {dimension_semantics = [], scalar_prefetch = 0 : i64, scratch_operands = 0 : i64, tpu.core_type = #tpu.core_type<tc>} {
    %c0 = arith.constant 0 : index
    %c0_0 = arith.constant 0 : index
    %0 = vector.load %arg0[%c0, %c0_0] : memref<8x128xf32, #tpu.memory_space<vmem>>, vector<8x128xf32>
    %cst = arith.constant dense<0.000000e+00> : vector<8xf32>
    %1 = vector.multi_reduction <add>, %0, %cst [1] : vector<8x128xf32> to vector<8xf32>
    %2 = vector.shape_cast %1 : vector<8xf32> to vector<8x1xf32>
    %cst_1 = arith.constant 3.125000e-02 : f32
    %3 = vector.broadcast %cst_1 : f32 to vector<8x1xf32>
    %4 = arith.mulf %2, %3 : vector<8x1xf32>
    %5 = vector.broadcast %4 : vector<8x1xf32> to vector<8x128xf32>
    %6 = arith.subf %0, %5 : vector<8x128xf32>
    %7 = tpu.iota {dimensions = array<i32: 1>} : vector<8x128xi32>
    %c32_i32 = arith.constant 32 : i32
    %8 = vector.broadcast %c32_i32 : i32 to vector<8x128xi32>
    %9 = arith.cmpi slt, %7, %8 : vector<8x128xi32>
    %cst_2 = arith.constant 0.000000e+00 : f32
    %10 = vector.broadcast %cst_2 : f32 to vector<8x128xf32>
    %11 = arith.select %9, %6, %10 : vector<8x128xi1>, vector<8x128xf32>
    %cst_3 = arith.constant dense<0.000000e+00> : vector<8x8xf32>
    %12 = tpu.matmul %11, %11, %cst_3 {dimension_numbers = #tpu.dot_dimension_numbers<[1], [1], [0], [0], [0, 0, 1, 0], [], []>} : vector<8x128xf32>, vector<8x128xf32>, vector<8x8xf32> -> vector<8x8xf32>
    %13 = tpu.iota {dimensions = array<i32: 0>} : vector<8x8xi32>
    %14 = tpu.iota {dimensions = array<i32: 1>} : vector<8x8xi32>
    %15 = arith.cmpi eq, %13, %14 : vector<8x8xi32>
    %cst_4 = arith.constant 1.000000e+00 : f32
    %cst_5 = arith.constant 0.000000e+00 : f32
    %16 = vector.broadcast %cst_4 : f32 to vector<8x8xf32>
    %17 = vector.broadcast %cst_5 : f32 to vector<8x8xf32>
    %18 = arith.select %15, %16, %17 : vector<8x8xi1>, vector<8x8xf32>
    %cst_6 = arith.constant 0.000000e+00 : f32
    %19 = vector.broadcast %cst_6 : f32 to vector<8x8xf32>
    %20 = arith.select %15, %12, %19 : vector<8x8xi1>, vector<8x8xf32>
    %21 = vector.shape_cast %20 : vector<8x8xf32> to vector<1x8x8xf32>
    %cst_7 = arith.constant dense<0.000000e+00> : vector<1xf32>
    %22 = vector.multi_reduction <add>, %21, %cst_7 [1, 2] : vector<1x8x8xf32> to vector<1xf32>
    %23 = vector.shape_cast %22 : vector<1xf32> to vector<1x1x1xf32>
    %24 = vector.extract %23[0, 0, 0] : f32 from vector<1x1x1xf32>
    %cst_8 = arith.constant 9.99999996E-13 : f32
    %25 = arith.maximumf %24, %cst_8 : f32
    %cst_9 = arith.constant 1.000000e+00 : f32
    %26 = arith.divf %cst_9, %25 : f32
    %27 = vector.broadcast %26 : f32 to vector<8x8xf32>
    %28 = arith.mulf %12, %27 : vector<8x8xf32>
    %cst_10 = arith.constant 1.500000e+00 : f32
    %29 = vector.broadcast %cst_10 : f32 to vector<8x8xf32>
    %30 = arith.mulf %29, %18 : vector<8x8xf32>
    %cst_11 = arith.constant 5.000000e-01 : f32
    %31 = vector.broadcast %cst_11 : f32 to vector<8x8xf32>
    %32 = arith.mulf %31, %28 : vector<8x8xf32>
    %33 = arith.subf %30, %32 : vector<8x8xf32>
    %cst_12 = arith.constant dense<0.000000e+00> : vector<8x8xf32>
    %34 = tpu.matmul %33, %33, %cst_12 {dimension_numbers = #tpu.dot_dimension_numbers<[1], [0], [0], [1], [0, 0, 1, 1], [], []>} : vector<8x8xf32>, vector<8x8xf32>, vector<8x8xf32> -> vector<8x8xf32>
    %cst_13 = arith.constant dense<0.000000e+00> : vector<8x8xf32>
    %35 = tpu.matmul %34, %33, %cst_13 {dimension_numbers = #tpu.dot_dimension_numbers<[1], [0], [0], [1], [0, 0, 1, 1], [], []>} : vector<8x8xf32>, vector<8x8xf32>, vector<8x8xf32> -> vector<8x8xf32>
    %cst_14 = arith.constant 1.500000e+00 : f32
    %36 = vector.broadcast %cst_14 : f32 to vector<8x8xf32>
    %37 = arith.mulf %36, %33 : vector<8x8xf32>
    %cst_15 = arith.constant dense<0.000000e+00> : vector<8x8xf32>
    %38 = tpu.matmul %35, %28, %cst_15 {dimension_numbers = #tpu.dot_dimension_numbers<[1], [0], [0], [1], [0, 0, 1, 1], [], []>} : vector<8x8xf32>, vector<8x8xf32>, vector<8x8xf32> -> vector<8x8xf32>
    %cst_16 = arith.constant 5.000000e-01 : f32
    %39 = vector.broadcast %cst_16 : f32 to vector<8x8xf32>
    %40 = arith.mulf %39, %38 : vector<8x8xf32>
    %41 = arith.subf %37, %40 : vector<8x8xf32>
    %cst_17 = arith.constant dense<0.000000e+00> : vector<8x8xf32>
    %42 = tpu.matmul %41, %41, %cst_17 {dimension_numbers = #tpu.dot_dimension_numbers<[1], [0], [0], [1], [0, 0, 1, 1], [], []>} : vector<8x8xf32>, vector<8x8xf32>, vector<8x8xf32> -> vector<8x8xf32>
    %cst_18 = arith.constant dense<0.000000e+00> : vector<8x8xf32>
    %43 = tpu.matmul %42, %41, %cst_18 {dimension_numbers = #tpu.dot_dimension_numbers<[1], [0], [0], [1], [0, 0, 1, 1], [], []>} : vector<8x8xf32>, vector<8x8xf32>, vector<8x8xf32> -> vector<8x8xf32>
    %cst_19 = arith.constant 1.500000e+00 : f32
    %44 = vector.broadcast %cst_19 : f32 to vector<8x8xf32>
    %45 = arith.mulf %44, %41 : vector<8x8xf32>
    %cst_20 = arith.constant dense<0.000000e+00> : vector<8x8xf32>
    %46 = tpu.matmul %43, %28, %cst_20 {dimension_numbers = #tpu.dot_dimension_numbers<[1], [0], [0], [1], [0, 0, 1, 1], [], []>} : vector<8x8xf32>, vector<8x8xf32>, vector<8x8xf32> -> vector<8x8xf32>
    %cst_21 = arith.constant 5.000000e-01 : f32
    %47 = vector.broadcast %cst_21 : f32 to vector<8x8xf32>
    %48 = arith.mulf %47, %46 : vector<8x8xf32>
    %49 = arith.subf %45, %48 : vector<8x8xf32>
    %cst_22 = arith.constant dense<0.000000e+00> : vector<8x8xf32>
    %50 = tpu.matmul %49, %49, %cst_22 {dimension_numbers = #tpu.dot_dimension_numbers<[1], [0], [0], [1], [0, 0, 1, 1], [], []>} : vector<8x8xf32>, vector<8x8xf32>, vector<8x8xf32> -> vector<8x8xf32>
    %cst_23 = arith.constant dense<0.000000e+00> : vector<8x8xf32>
    %51 = tpu.matmul %50, %49, %cst_23 {dimension_numbers = #tpu.dot_dimension_numbers<[1], [0], [0], [1], [0, 0, 1, 1], [], []>} : vector<8x8xf32>, vector<8x8xf32>, vector<8x8xf32> -> vector<8x8xf32>
    %cst_24 = arith.constant 1.500000e+00 : f32
    %52 = vector.broadcast %cst_24 : f32 to vector<8x8xf32>
    %53 = arith.mulf %52, %49 : vector<8x8xf32>
    %cst_25 = arith.constant dense<0.000000e+00> : vector<8x8xf32>
    %54 = tpu.matmul %51, %28, %cst_25 {dimension_numbers = #tpu.dot_dimension_numbers<[1], [0], [0], [1], [0, 0, 1, 1], [], []>} : vector<8x8xf32>, vector<8x8xf32>, vector<8x8xf32> -> vector<8x8xf32>
    %cst_26 = arith.constant 5.000000e-01 : f32
    %55 = vector.broadcast %cst_26 : f32 to vector<8x8xf32>
    %56 = arith.mulf %55, %54 : vector<8x8xf32>
    %57 = arith.subf %53, %56 : vector<8x8xf32>
    %cst_27 = arith.constant 0.0322580636 : f32
    %58 = arith.mulf %25, %cst_27 : f32
    %59 = math.rsqrt %58 : f32
    %60 = vector.broadcast %59 : f32 to vector<8x8xf32>
    %61 = arith.mulf %57, %60 : vector<8x8xf32>
    %cst_28 = arith.constant dense<0.000000e+00> : vector<8x128xf32>
    %62 = tpu.matmul %61, %11, %cst_28 {dimension_numbers = #tpu.dot_dimension_numbers<[0], [0], [1], [1], [0, 1, 1, 1], [], []>} : vector<8x8xf32>, vector<8x128xf32>, vector<8x128xf32> -> vector<8x128xf32>
    %c0_29 = arith.constant 0 : index
    %c0_30 = arith.constant 0 : index
    %63 = vector.load %arg1[%c0_29, %c0_30] : memref<8x128xf32, #tpu.memory_space<vmem>>, vector<8x128xf32>
    tpu.vector_store %arg1[%c0_29, %c0_30], %62 {strides = array<i32>} : memref<8x128xf32, #tpu.memory_space<vmem>>, vector<8x128xf32>,
    return
  }
}

</mosaic_0001>

<bundles_post_ra>
// kernel: whitening2d.1
= control target key start
LH: loop header
LB: loop body
LE: loop exit
PB: predicated region body
PF: predicated region fallthrough
CT: control target
= control target key end

     0   :  { %s1126_s0 = inlined_call_operand.vmem [shape: f32[8,128], index: 0, kind: input, shape index: {}]   ;;  %s1127_s1 = inlined_call_operand.hbm [shape: f32[8,128], index: 1, kind: output, shape index: {}]  }
   0x1   :  { %v9_v0 = vld [vmem:[%s1126_s0] sm:$0xff] }
   0x2   :  { %6 = vsyncpa [#allocation3], 0  ;;  %10 = vadd.xlane.f32.xlu0 %v9_v0  ;;  %v1033_v1 = vmov 0.0   ;;  %vm1034_vm0 = vmmov 0   ;;  %v14_v2 = vlaneseq  ;;  %vm93_vm3 = vcmask 64512   ;;  %s1036_s13 = smov [#allocation2]  }
   0x3   :  { %940 = vmatprep.subr.mxu0 %v1033_v1  ;;  %945 = vmatprep.subr.mxu1 %v1033_v1  ;;  %s1035_s8 = smov 1e-12   ;;  %s897_s14 = sshll.u32 %s1036_s13, 4  ;;  %s898_s14 = int_to_ptr.vmem [resolvable:$true] %s897_s14 }
   0x4   :  { %942 = vmatprep.mubr.msk.f32.mxu0 %vm1034_vm0, %v1033_v1  ;;  %947 = vmatprep.mubr.msk.f32.mxu1 %vm1034_vm0, %v1033_v1  ;;  %v1056_v3 = vand.u32 127, %v14_v2  ;;  %v89_v7 = vshrl.u32 %v14_v2, 7  ;;  %s1009_s15 = scalar_lea.vmem %s898_s14, 128  ;;  %p1014_p1 = scmp.lt.s32.totalorder %s898_s14, %s898_s14 }
   0x5   :  { %p1010_p0 = scmp.ne.s32.totalorder %s898_s14, %s1009_s15  ;;  %p1015_p2 = scmp.lt.s32.totalorder %s1009_s15, %s1009_s15 }
   0x6   :  { %vm16_vm1 = vcmp.lt.s32.totalorder %v1056_v3, 32  ;;  %vm90_vm2 = vcmp.eq.s32.totalorder %v89_v7, %v1056_v3 }
   0x7   :  { %v91_v23 = vsel %vm90_vm2, 1.0, %v1033_v1  ;;  %p1016_p3 = por %p1015_p2, %p1014_p1 }
   0x8   :  { %v110_v25 = vmul.f32 1.5, %v91_v23 }
   0x9   :  { %p1017_p4 = pnand %p1016_p3, %p1010_p0 }
  0x8f   :  { %v11_v4 = vpop.xlane.xlu0 %10 }
  0x90   :  { %v12_v5 = vmul.f32 0.03125, %v11_v4 }
  0x92   :  { %v1059_v6 = vsub.f32 %v9_v0, %v12_v5 }
  0x94   :  { %941 = vmatpush3.xpose.msk.msra.mxu0 %vm16_vm1, %v1059_v6 }
  0x95   :  { %955 = vmatprep.subr.mxu0 %v1033_v1 }
  0x97   :  { %943 = vmatmul.mubr.msk.f32.vlgmr.msra.gmra.mrb[0].mxu0 %vm16_vm1, %v1059_v6 }
  0x98   :  { %957 = vmatprep.mubr.msk.f32.mxu0 %vm1034_vm0, %v1033_v1 }
 0x16a   :  { %v84_v8 = vpop.f32.mrb[0].mxu0 }
 0x16b   :  { %v944_v9 = vpop.f32.mrb[1].mxu0  ;;  %v92_v10 = vsel %vm90_vm2, %v84_v8, 0.0 }
 0x16c   :  { %v94_v11 = vsel %vm93_vm3, %v92_v10, 0.0 }
 0x16d   :  { %95 = vadd.xlane.f32.xlu0 %v94_v11 }
 0x1fa   :  { %v96_v12 = vpop.xlane.xlu0 %95 }
 0x1fb   :  { %v97_v13 = vrot.slane %v96_v12, 4 }
 0x1fd   :  { %v98_v14 = vadd.f32 %v97_v13, %v96_v12 }
 0x1ff   :  { %v99_v15 = vrot.slane %v98_v14, 2 }
 0x201   :  { %v100_v16 = vadd.f32 %v99_v15, %v98_v14 }
 0x203   :  { %v101_v17 = vrot.slane %v100_v16, 1 }
 0x205   :  { %v102_v18 = vadd.f32 %v101_v17, %v100_v16 }
 0x207   :  { %995 = vpush %v102_v18 }
 0x238   :  { %s996_s0 = spop %995 }
 0x239   :  { %s104_s9 = smax.f32 %s1035_s8, %s996_s0 }
 0x23a   :  { %v105_v19 = vstv %s104_s9  ;;  %s779_s10 = smul.f32 0.032258064, %s104_s9 }
 0x23b   :  { %1005 = vrcp.f32 %v105_v19 }
 0x23c   :  { %v780_v20 = vstv %s779_s10 }
 0x23d   :  { %1007 = vrsqrt.f32 %v780_v20 }
 0x245   :  { %v1006_v21 = vpop.eup %1005 }
 0x246   :  { %997 = vpush %v1006_v21 }
 0x247   :  { %v1008_v22 = vpop.eup %1007 }
 0x248   :  { %999 = vpush %v1008_v22 }
 0x277   :  { %s998_s11 = spop %997 }
 0x278   :  { %v108_v24 = vstv %s998_s11 }
 0x279   :  { %v109_v26 = vmul.f32 %v108_v24, %v84_v8  ;;  %s1000_s12 = spop %999 }
 0x27a   :  { %v783_v56 = vstv %s1000_s12 }
 0x27b   :  { %956 = vmatpush3.msra.mxu0 %v109_v26  ;;  %v111_v27 = vmul.f32 0.5, %v109_v26 }
 0x27c   :  { %965 = vmatprep.subr.mxu0 %v1033_v1 }
 0x27d   :  { %v112_v28 = vsub.f32 %v110_v25, %v111_v27 }
 0x27f   :  { %946 = vmatpush3.msra.mxu1 %v112_v28  ;;  %v259_v34 = vmul.f32 1.5, %v112_v28 }
 0x280   :  { %948 = vmatmul.mubr.msk.f32.vlgmr.msra.gmra.mrb[0].mxu1 %vm93_vm3, %v112_v28  ;;  %950 = vmatprep.subr.mxu1 %v1033_v1 }
 0x281   :  { %951 = vmatpush3.msra.mxu1 %v112_v28  ;;  %952 = vmatprep.mubr.msk.f32.mxu1 %vm1034_vm0, %v1033_v1 }
 0x282   :  { %960 = vmatprep.subr.mxu1 %v1033_v1 }
 0x353   :  { %v182_v29 = vpop.f32.mrb[0].mxu1 }
 0x354   :  { %v949_v30 = vpop.f32.mrb[1].mxu1  ;;  %953 = vmatmul.mubr.msk.f32.vlgmr.msra.gmra.mrb[2].mxu1 %vm93_vm3, %v182_v29 }
 0x355   :  { %962 = vmatprep.mubr.msk.f32.mxu1 %vm1034_vm0, %v1033_v1 }
 0x427   :  { %v255_v31 = vpop.f32.mrb[2].mxu1 }
 0x428   :  { %v954_v32 = vpop.f32.mrb[3].mxu1  ;;  %958 = vmatmul.mubr.msk.f32.vlgmr.msra.gmra.mrb[2].mxu0 %vm93_vm3, %v255_v31 }
 0x429   :  { %967 = vmatprep.mubr.msk.f32.mxu0 %vm1034_vm0, %v1033_v1 }
 0x4fb   :  { %v329_v33 = vpop.f32.mrb[2].mxu0 }
 0x4fc   :  { %v333_v35 = vmul.f32 0.5, %v329_v33  ;;  %v959_v36 = vpop.f32.mrb[3].mxu0 }
 0x4fe   :  { %v334_v37 = vsub.f32 %v259_v34, %v333_v35 }
 0x500   :  { %961 = vmatpush3.msra.mxu1 %v334_v37  ;;  %966 = vmatpush3.msra.mxu0 %v334_v37  ;;  %v481_v43 = vmul.f32 1.5, %v334_v37 }
 0x501   :  { %963 = vmatmul.mubr.msk.f32.vlgmr.msra.gmra.mrb[4].mxu1 %vm93_vm3, %v334_v37  ;;  %970 = vmatprep.subr.mxu1 %v1033_v1 }
 0x502   :  { %971 = vmatpush3.msra.mxu1 %v109_v26  ;;  %972 = vmatprep.mubr.msk.f32.mxu1 %vm1034_vm0, %v1033_v1 }
 0x503   :  { %975 = vmatprep.subr.mxu0 %v1033_v1  ;;  %980 = vmatprep.subr.mxu1 %v1033_v1 }
 0x5d4   :  { %v404_v38 = vpop.f32.mrb[4].mxu1 }
 0x5d5   :  { %v964_v39 = vpop.f32.mrb[5].mxu1  ;;  %968 = vmatmul.mubr.msk.f32.vlgmr.msra.gmra.mrb[4].mxu0 %vm93_vm3, %v404_v38 }
 0x5d6   :  { %977 = vmatprep.mubr.msk.f32.mxu0 %vm1034_vm0, %v1033_v1 }
 0x6a8   :  { %v477_v40 = vpop.f32.mrb[4].mxu0 }
 0x6a9   :  { %v969_v41 = vpop.f32.mrb[5].mxu0  ;;  %973 = vmatmul.mubr.msk.f32.vlgmr.msra.gmra.mrb[6].mxu1 %vm93_vm3, %v477_v40 }
 0x6aa   :  { %982 = vmatprep.mubr.msk.f32.mxu1 %vm1034_vm0, %v1033_v1 }
 0x77c   :  { %v551_v42 = vpop.f32.mrb[6].mxu1 }
 0x77d   :  { %v555_v44 = vmul.f32 0.5, %v551_v42  ;;  %v974_v45 = vpop.f32.mrb[7].mxu1 }
 0x77f   :  { %v556_v46 = vsub.f32 %v481_v43, %v555_v44 }
 0x781   :  { %976 = vmatpush3.msra.mxu0 %v556_v46  ;;  %981 = vmatpush3.msra.mxu1 %v556_v46  ;;  %v703_v54 = vmul.f32 1.5, %v556_v46 }
 0x782   :  { %978 = vmatmul.mubr.msk.f32.vlgmr.msra.gmra.mrb[6].mxu0 %vm93_vm3, %v556_v46  ;;  %985 = vmatprep.subr.mxu0 %v1033_v1 }
 0x783   :  { %986 = vmatpush3.msra.mxu0 %v109_v26  ;;  %990 = vmatprep.subr.mxu1 %v1033_v1 }
 0x784   :  { %987 = vmatprep.mubr.msk.f32.mxu0 %vm1034_vm0, %v1033_v1 }
 0x855   :  { %v626_v47 = vpop.f32.mrb[6].mxu0 }
 0x856   :  { %v979_v48 = vpop.f32.mrb[7].mxu0  ;;  %983 = vmatmul.mubr.msk.f32.vlgmr.msra.gmra.mrb[8].mxu1 %vm93_vm3, %v626_v47 }
 0x857   :  { %991 = vmatpush3.msk.msra.mxu1 %vm16_vm1, %v1059_v6  ;;  %992 = vmatprep.mubr.msk.f32.mxu1 %vm1034_vm0, %v1033_v1 }
 0x929   :  { %v699_v49 = vpop.f32.mrb[8].mxu1 }
 0x92a   :  { %v984_v50 = vpop.f32.mrb[9].mxu1  ;;  %988 = vmatmul.mubr.msk.f32.vlgmr.msra.gmra.mrb[8].mxu0 %vm93_vm3, %v699_v49 }
 0x9fd   :  { %v773_v51 = vpop.f32.mrb[8].mxu0 }
 0x9fe   :  { %v777_v52 = vmul.f32 0.5, %v773_v51  ;;  %v989_v53 = vpop.f32.mrb[9].mxu0 }
 0xa00   :  { %v778_v55 = vsub.f32 %v703_v54, %v777_v52 }
 0xa02   :  { %v784_v57 = vmul.f32 %v783_v56, %v778_v55 }
 0xa04   :  { %785 = vxpose.xlu1.b32.start.end [1/1] (short) (narrow) %v784_v57, 8 }
 0xa84   :  { %v801_v58 = vpop.trf.xlu1 }
 0xa85   :  { %993 = vmatmul.mubr.msk.f32.vlgmr.msra.gmra.mrb[10].mxu1 %vm93_vm3, %v801_v58 }
 0xb58   :  { %v886_v59 = vpop.f32.mrb[10].mxu1 }
 0xb59   :  { %890 = vst [vmem:[#allocation2] sm:$0xff] %v886_v59  ;;  %v994_v60 = vpop.f32.mrb[11].mxu1 }
 0xb5a   :  { %1020 = shalt.err (!%p1017_p4)
}
 0xb5b   :  { %s1021_s18 = scalar_lea.hbm %s1127_s1, 128 }
 0xb5c   :  { %p1022_p5 = scmp.ne.s32.totalorder %s1127_s1, %s1021_s18  ;;  %p1025_p6 = scmp.lt.u32.totalorder %s1021_s18, %s1127_s1 }
 0xb5e   :  { %p1027_p7 = pnand %p1025_p6, %p1022_p5 }
 0xb60   :  { %1030 = shalt.err (!%p1027_p7)
}
 0xb61   :  { %900 = dma.vmem_to_hbm [thread:$0]  %s898_s14, 128, %s1127_s1, [#allocation3]  }
 0xb62   :  { %1031 = dma.done.wait [#allocation3], 128  }
 0xb63   :  { %1032 = vsyncadd [#allocation3], 4294967168 }
 0xb64   :  { %904 = vsyncpa [#allocation3], 1 }

</bundles_post_ra>
